<compile_context>
chip_gen: v6e
topology: v6e:2x2x1
jax: 0.10.0
libtpu: 0.0.40
codegen_flags: <defaults>
</compile_context>

<pallas_src>
import jax
import jax.numpy as jnp
from jax.experimental import pallas as pl
from jax.experimental.pallas import tpu as pltpu

_MIN = 1e-4
_MAX = 1e4
_SOFTPLUS_THRESHOLD = 20.0  # matches torch.nn.functional.softplus default

_FAST_PATH_BYTES = 1 << 20   # <= 1 MiB: single block, skip tiling entirely
_MAX_BLOCK_BYTES = 2 << 20   # ~2 MiB per buffer; safe on v5e's 16 MiB scoped VMEM


def _dispact_kernel(x_ref, o_ref):
    # Compute in f32 regardless of input dtype (cheap; keeps v5e off the
    # bf16-less VPU/EUP packing path).
    x = x_ref[...].astype(jnp.float32)
    # PyTorch softplus (beta=1, threshold=20): x if x > 20 else log1p(exp(x)).
    safe_x = jnp.minimum(x, _SOFTPLUS_THRESHOLD)
    sp = jnp.where(x > _SOFTPLUS_THRESHOLD, x, jnp.log1p(jnp.exp(safe_x)))
    o_ref[...] = jnp.clip(sp, _MIN, _MAX).astype(o_ref.dtype)


def _single_block_call(x2: jax.Array, dtype) -> jax.Array:
    # Whole array as one block, no grid: minimal fixed cost for small inputs.
    return pl.pallas_call(
        _dispact_kernel,
        out_shape=jax.ShapeDtypeStruct(x2.shape, dtype),
    )(x2)


def dispact(x: jax.Array) -> jax.Array:
    """clamp(softplus(x), 1e-4, 1e4), elementwise, any shape."""
    orig_shape = x.shape
    dtype = x.dtype
    n = x.size
    itemsize = jnp.dtype(dtype).itemsize

    if n % 128 != 0:
        # Rare ragged case: run the whole tensor as one full-array block
        # (full-array block shapes are exempt from the (8,128) rule).
        # TODO(synk): a very large ragged input would need a padded tiled path.
        return _single_block_call(x.reshape(1, n), dtype).reshape(orig_shape)

    # Lane-dense 2D slab: widest lane dim (multiple of 128) dividing the size.
    lanes = 128
    for cand in (1024, 512, 256, 128):
        if n % cand == 0:
            lanes = cand
            break
    rows = n // lanes
    x2 = x.reshape(rows, lanes)

    # Fast path for small tensors: one block, no grid / pipelining overhead.
    if n * itemsize <= _FAST_PATH_BYTES:
        return _single_block_call(x2, dtype).reshape(orig_shape)

    # Tiled path: large blocks so per-grid-step overhead is amortized.
    bytes_per_row = lanes * itemsize
    max_rows = max(8, (_MAX_BLOCK_BYTES // bytes_per_row) // 8 * 8)
    start = max(8, (min(max_rows, rows) // 8) * 8)
    block_rows = 0
    for cand in range(start, 7, -8):
        if rows % cand == 0:
            block_rows = cand           # divides exactly -> no ragged last block
            break
    if block_rows == 0:
        block_rows = start              # ragged last block; Pallas masks the tail

    grid = (pl.cdiv(rows, block_rows),)
    # NOTE: on v7x one could add pipeline_mode=pl.Buffered(3) on the input spec
    # for deeper DMA overlap; default double-buffering is kept here so the same
    # VMEM budget works on v5e/v6e/v7x.
    out2 = pl.pallas_call(
        _dispact_kernel,
        out_shape=jax.ShapeDtypeStruct((rows, lanes), dtype),
        grid_spec=pltpu.PrefetchScalarGridSpec(
            num_scalar_prefetch=0,
            grid=grid,
            in_specs=[pl.BlockSpec((block_rows, lanes), lambda i: (i, 0))],
            out_specs=pl.BlockSpec((block_rows, lanes), lambda i: (i, 0)),
        ),
        compiler_params=pltpu.CompilerParams(
            dimension_semantics=("parallel",),
        ),
    )(x2)
    return out2.reshape(orig_shape)


if __name__ == "__main__":
    key = jax.random.PRNGKey(0)
    k1, k2 = jax.random.split(key)

    def ref_fn(x):
        sp = jnp.where(
            x > _SOFTPLUS_THRESHOLD,
            x,
            jnp.log1p(jnp.exp(jnp.minimum(x, _SOFTPLUS_THRESHOLD))),
        )
        return jnp.clip(sp, _MIN, _MAX)

    # Small NCHW input (exercises the single-block fast path).
    x_small = jax.random.normal(k1, (2, 4, 16, 16), dtype=jnp.float32) * 5.0
    out_small = jax.block_until_ready(dispact(x_small))
    assert out_small.shape == x_small.shape
    assert jnp.allclose(out_small, ref_fn(x_small), atol=1e-6, rtol=1e-6)

    # Larger input (exercises the tiled multi-block path: 2048x1024 slab,
    # 512-row blocks, 4 grid steps).
    x_big = jax.random.normal(k2, (4, 8, 128, 512), dtype=jnp.float32) * 5.0
    out_big = jax.block_until_ready(dispact(x_big))
    assert out_big.shape == x_big.shape
    assert jnp.allclose(out_big, ref_fn(x_big), atol=1e-6, rtol=1e-6)

    print("KERNEL_OK")
</pallas_src>

<mosaic_0001>
module attributes {stable_mosaic.version = 11 : i64} {
  func.func @_dispact_kernel(%arg0: memref<2x1024xf32, #tpu.memory_space<vmem>>, %arg1: memref<2x1024xf32, #tpu.memory_space<vmem>>) attributes {dimension_semantics = [], scalar_prefetch = 0 : i64, scratch_operands = 0 : i64, tpu.core_type = #tpu.core_type<tc>} {
    %c0 = arith.constant 0 : index
    %c0_0 = arith.constant 0 : index
    %0 = vector.load %arg0[%c0, %c0_0] : memref<2x1024xf32, #tpu.memory_space<vmem>>, vector<2x1024xf32>
    %cst = arith.constant 2.000000e+01 : f32
    %1 = vector.broadcast %cst : f32 to vector<2x1024xf32>
    %2 = arith.minimumf %0, %1 : vector<2x1024xf32>
    %cst_1 = arith.constant 2.000000e+01 : f32
    %3 = vector.broadcast %cst_1 : f32 to vector<2x1024xf32>
    %4 = arith.cmpf ogt, %0, %3 : vector<2x1024xf32>
    %5 = math.exp %2 : vector<2x1024xf32>
    %6 = math.log1p %5 : vector<2x1024xf32>
    %7 = arith.select %4, %0, %6 : vector<2x1024xi1>, vector<2x1024xf32>
    %cst_2 = arith.constant 9.99999974E-5 : f32
    %cst_3 = arith.constant 1.000000e+04 : f32
    %8 = vector.broadcast %cst_2 : f32 to vector<2x1024xf32>
    %9 = arith.maximumf %8, %7 : vector<2x1024xf32>
    %10 = vector.broadcast %cst_3 : f32 to vector<2x1024xf32>
    %11 = arith.minimumf %10, %9 : vector<2x1024xf32>
    %c0_4 = arith.constant 0 : index
    %c0_5 = arith.constant 0 : index
    %12 = vector.load %arg1[%c0_4, %c0_5] : memref<2x1024xf32, #tpu.memory_space<vmem>>, vector<2x1024xf32>
    tpu.vector_store %arg1[%c0_4, %c0_5], %11 {strides = array<i32>} : memref<2x1024xf32, #tpu.memory_space<vmem>>, vector<2x1024xf32>,
    return
  }
}

</mosaic_0001>

<bundles_post_ra>
// kernel: tpu_custom_call.1
= control target key start
LH: loop header
LB: loop body
LE: loop exit
PB: predicated region body
PF: predicated region fallthrough
CT: control target
= control target key end

     0   :  { %6 = vsyncpa [#allocation3], 0  ;;  %s144_s0 = inlined_call_operand.hbm [shape: f32[2,1024], index: 0, kind: input, shape index: {}]   ;;  %s145_s1 = inlined_call_operand.hbm [shape: f32[2,1024], index: 1, kind: output, shape index: {}]  }
   0x1   :  { %7 = vsyncpa [#allocation4], 0  ;;  %s126_s6 = smov [#allocation2]  }
   0x2   :  { %s14_s7 = sshll.u32 %s126_s6, 4  ;;  %s15_s7 = int_to_ptr.vmem [resolvable:$true] %s14_s7 }
   0x3   :  { %s90_s8 = scalar_lea.vmem %s15_s7, 256  ;;  %p95_p1 = scmp.lt.s32.totalorder %s15_s7, %s15_s7 }
   0x4   :  { %p91_p0 = scmp.ne.s32.totalorder %s15_s7, %s90_s8  ;;  %p96_p2 = scmp.lt.s32.totalorder %s90_s8, %s90_s8 }
   0x6   :  { %p97_p3 = por %p96_p2, %p95_p1 }
   0x8   :  { %p98_p4 = pnand %p97_p3, %p91_p0 }
   0xa   :  { %101 = shalt.err (!%p98_p4)
}
   0xb   :  { %17 = dma.hbm_to_vmem [thread:$0]  %s144_s0, 256, %s15_s7, [#allocation3]  }
   0xc   :  { %122 = dma.done.wait [#allocation3], 256  }
   0xd   :  { %123 = vsyncadd [#allocation3], 4294967040  ;;  %v21_v0 = vld [vmem:[#allocation2] sm:$0xff]  ;;  %v22_v1 = vld [vmem:[#allocation2 + $0x8] sm:$0xff]  ;;  %s127_s0 = smov [#allocation5]  }
   0xe   :  { %v23_v2 = vmin.f32 %v21_v0, 20.0  ;;  %v24_v3 = vmin.f32 %v22_v1, 20.0  ;;  %vm25_vm1 = vcmp.gt.f32.partialorder %v21_v0, 20.0  ;;  %vm26_vm3 = vcmp.gt.f32.partialorder %v22_v1, 20.0  ;;  %s63_s11 = sshll.u32 %s127_s0, 4  ;;  %s64_s11 = int_to_ptr.vmem [resolvable:$true] %s63_s11 }
   0xf   :  { %s102_s12 = scalar_lea.vmem %s64_s11, 256  ;;  %p107_p6 = scmp.lt.s32.totalorder %s64_s11, %s64_s11 }
  0x10   :  { %v27_v4 = vmul.f32 1.442695, %v23_v2  ;;  %v29_v5 = vmul.f32 1.442695, %v24_v3  ;;  %p103_p5 = scmp.ne.s32.totalorder %s64_s11, %s102_s12  ;;  %p108_p7 = scmp.lt.s32.totalorder %s102_s12, %s102_s12 }
  0x12   :  { %74 = vpow2.f32 %v27_v4  ;;  %p109_p8 = por %p108_p7, %p107_p6 }
  0x13   :  { %76 = vpow2.f32 %v29_v5 }
  0x14   :  { %p110_p9 = pnand %p109_p8, %p103_p5 }
  0x1f   :  { %v75_v6 = vpop.eup %74 }
  0x20   :  { %v77_v7 = vpop.eup %76  ;;  %v31_v8 = vadd.f32 1.0, %v75_v6  ;;  %v34_v10 = vmul.f32 -0.5, %v75_v6  ;;  %v37_v13 = vand.u32 2147483647, %v75_v6 }
  0x21   :  { %v40_v9 = vadd.f32 1.0, %v77_v7  ;;  %v43_v11 = vmul.f32 -0.5, %v77_v7  ;;  %v46_v15 = vand.u32 2147483647, %v77_v7 }
  0x22   :  { %78 = vlog2.f32 %v31_v8  ;;  %v35_v12 = vadd.f32 1.0, %v34_v10  ;;  %vm38_vm0 = vcmp.lt.f32.partialorder %v37_v13, 0.0004427343 }
  0x23   :  { %80 = vlog2.f32 %v40_v9  ;;  %v44_v14 = vadd.f32 1.0, %v43_v11  ;;  %vm47_vm2 = vcmp.lt.f32.partialorder %v46_v15, 0.0004427343 }
  0x24   :  { %v36_v16 = vmul.f32 %v75_v6, %v35_v12 }
  0x25   :  { %v45_v18 = vmul.f32 %v77_v7, %v44_v14 }
  0x2f   :  { %v79_v17 = vpop.eup %78 }
  0x30   :  { %v81_v19 = vpop.eup %80  ;;  %v33_v20 = vmul.f32 0.6931472, %v79_v17 }
  0x31   :  { %v42_v21 = vmul.f32 0.6931472, %v81_v19 }
  0x32   :  { %v39_v22 = vsel %vm38_vm0, %v36_v16, %v33_v20 }
  0x33   :  { %v49_v23 = vsel %vm25_vm1, %v21_v0, %v39_v22  ;;  %v48_v24 = vsel %vm47_vm2, %v45_v18, %v42_v21 }
  0x34   :  { %v51_v25 = vmax.f32 %v49_v23, 0.0001  ;;  %v50_v26 = vsel %vm26_vm3, %v22_v1, %v48_v24 }
  0x35   :  { %v52_v27 = vmax.f32 %v50_v26, 0.0001 }
  0x36   :  { %v53_v28 = vmin.f32 %v51_v25, 10000.0 }
  0x37   :  { %v54_v29 = vmin.f32 %v52_v27, 10000.0 }
  0x38   :  { %55 = vst [vmem:[#allocation5] sm:$0xff] %v53_v28 }
  0x39   :  { %56 = vst [vmem:[#allocation5 + $0x8] sm:$0xff] %v54_v29 }
  0x3a   :  { %113 = shalt.err (!%p110_p9)
}
  0x3b   :  { %66 = dma.vmem_to_hbm [thread:$0]  %s64_s11, 256, %s145_s1, [#allocation4]  }
  0x3c   :  { %124 = dma.done.wait [#allocation4], 256  }
  0x3d   :  { %125 = vsyncadd [#allocation4], 4294967040 }
  0x3e   :  { %70 = vsyncpa [#allocation3], 1 }
  0x3f   :  { %71 = vsyncpa [#allocation4], 1 }

</bundles_post_ra>
